<compile_context>
chip_gen: v7x
topology: tpu7x:2x2x1
jax: 0.10.0
libtpu: 0.0.40
codegen_flags: <defaults>
</compile_context>

<pallas_src>
import jax
import jax.numpy as jnp
from jax.experimental import pallas as pl
from jax.experimental.pallas import tpu as pltpu

LANE = 128


def _round_up(n, m):
    return ((n + m - 1) // m) * m


def _pick_tile_b(B, max_tile=512, min_steps=4):
    """Largest tile (<= max_tile) that still leaves >= min_steps grid steps."""
    tile = min(max_tile, _round_up(-(-B // min_steps), 8))
    return max(tile, 8)


# ---------------------------------------------------------------------------
# Kernel: one TILE_B x in_dim slab of f32 x -> TILE_B x padded_class bf16 logits.
# All weights pre-transposed to [in_features, out_features]; BN pre-folded.
# ---------------------------------------------------------------------------
def advnet_kernel(x_ref, wb_ref, bb_ref, w1_ref, b1_ref, w2_ref, b2_ref,
                  w3_ref, b3_ref, o_ref):
    # Cast the x tile to bf16 in-kernel (x is read from HBM as f32 exactly once).
    x = x_ref[...].astype(jnp.bfloat16)

    # bottleneck_layer: Linear (BatchNorm eval stats folded) -> ReLU -> Dropout(id)
    h = jnp.dot(x, wb_ref[...], preferred_element_type=jnp.float32) + bb_ref[...]
    h = jnp.maximum(h, 0.0).astype(jnp.bfloat16)

    # relation_module (GRL forward is identity): fc1 -> ReLU -> Dropout(identity)
    h = jnp.dot(h, w1_ref[...], preferred_element_type=jnp.float32) + b1_ref[...]
    h = jnp.maximum(h, 0.0).astype(jnp.bfloat16)

    # fc2 -> ReLU   (fc2 output lane-padded to 128; padded cols stay exactly 0)
    h = jnp.dot(h, w2_ref[...], preferred_element_type=jnp.float32) + b2_ref[...]
    h = jnp.maximum(h, 0.0).astype(jnp.bfloat16)

    # fc3 (class dim lane-padded to 128); bf16 store halves output HBM traffic.
    logits = jnp.dot(h, w3_ref[...], preferred_element_type=jnp.float32) + b3_ref[...]
    o_ref[...] = logits.astype(o_ref.dtype)


# ---------------------------------------------------------------------------
# Parameter construction (matches the PyTorch init) and kernel-side prep.
# ---------------------------------------------------------------------------
def init_params(key, in_dim, bottleneck_dim, width, class_num):
    k0, k1, k2, k3 = jax.random.split(key, 4)
    # bottleneck Linear: weight ~ N(0, 0.005), bias = 0.1  (stored as [in, out])
    wb = (0.005 * jax.random.normal(k0, (in_dim, bottleneck_dim))).astype(jnp.float32)
    bb = jnp.full((bottleneck_dim,), 0.1, jnp.float32)
    # BatchNorm1d eval-mode stats as freshly initialized by nn.BatchNorm1d
    bn_gamma = jnp.ones((bottleneck_dim,), jnp.float32)
    bn_beta = jnp.zeros((bottleneck_dim,), jnp.float32)
    bn_mean = jnp.zeros((bottleneck_dim,), jnp.float32)
    bn_var = jnp.ones((bottleneck_dim,), jnp.float32)
    # relation_module fc1/fc2/fc3: weight ~ N(0, 0.01), bias = 0
    w1 = (0.01 * jax.random.normal(k1, (bottleneck_dim, width))).astype(jnp.float32)
    b1 = jnp.zeros((width,), jnp.float32)
    w2 = (0.01 * jax.random.normal(k2, (width, 64))).astype(jnp.float32)
    b2 = jnp.zeros((64,), jnp.float32)
    w3 = (0.01 * jax.random.normal(k3, (64, class_num))).astype(jnp.float32)
    b3 = jnp.zeros((class_num,), jnp.float32)
    return dict(wb=wb, bb=bb, bn_gamma=bn_gamma, bn_beta=bn_beta,
                bn_mean=bn_mean, bn_var=bn_var,
                w1=w1, b1=b1, w2=w2, b2=b2, w3=w3, b3=b3)


def prepare_params(p, eps=1e-5):
    """Fold BN into the bottleneck, zero-pad narrow feature dims to 128 lanes,
    cast weights to bf16 (biases stay f32)."""
    scale = p["bn_gamma"] / jnp.sqrt(p["bn_var"] + eps)
    shift = p["bn_beta"] - p["bn_mean"] * scale
    wb = p["wb"] * scale[None, :]
    bb = p["bb"] * scale + shift

    def pad_cols(w, b, to):
        pad = to - w.shape[1]
        if pad > 0:
            w = jnp.pad(w, ((0, 0), (0, pad)))
            b = jnp.pad(b, ((0, pad),))
        return w, b

    def pad_rows(w, to):
        pad = to - w.shape[0]
        if pad > 0:
            w = jnp.pad(w, ((0, pad), (0, 0)))
        return w

    w1, b1 = p["w1"], p["b1"]
    w2, b2 = p["w2"], p["b2"]
    w3, b3 = p["w3"], p["b3"]

    fc2_pad = _round_up(w2.shape[1], LANE)     # 64  -> 128
    cls_pad = _round_up(w3.shape[1], LANE)     # 10  -> 128
    w2, b2 = pad_cols(w2, b2, fc2_pad)         # padded cols -> ReLU(0+0) = 0
    w3 = pad_rows(w3, fc2_pad)                 # padded rows multiply zeros
    w3, b3 = pad_cols(w3, b3, cls_pad)         # padded logits sliced off later

    bf16 = lambda a: a.astype(jnp.bfloat16)
    row = lambda b: b.reshape(1, -1).astype(jnp.float32)
    return (bf16(wb), row(bb), bf16(w1), row(b1),
            bf16(w2), row(b2), bf16(w3), row(b3))


# ---------------------------------------------------------------------------
# Wrapper: batch-tiled pallas_call.
# ---------------------------------------------------------------------------
def advnet_forward(x, prepared_params, class_num, tile_b=None, slice_output=True):
    wb, bb, w1, b1, w2, b2, w3, b3 = prepared_params
    B, in_dim = x.shape
    out_pad = w3.shape[1]

    if tile_b is None:
        tile_b = _pick_tile_b(B)
    padded_b = _round_up(max(B, 1), tile_b)
    if padded_b != B:                      # only pad when actually needed
        x = jnp.pad(x, ((0, padded_b - B), (0, 0)))
    grid = (padded_b // tile_b,)

    weight_operands = (wb, bb, w1, b1, w2, b2, w3, b3)

    def const_spec(shape):
        nd = len(shape)
        # Constant block index -> DMA'd once; single buffer is enough.
        return pl.BlockSpec(shape, lambda i, _nd=nd: (0,) * _nd,
                            pipeline_mode=pl.Buffered(1))

    in_specs = [pl.BlockSpec((tile_b, in_dim), lambda i: (i, 0))]
    in_specs += [const_spec(a.shape) for a in weight_operands]

    out = pl.pallas_call(
        advnet_kernel,
        out_shape=jax.ShapeDtypeStruct((padded_b, out_pad), jnp.bfloat16),
        grid_spec=pltpu.PrefetchScalarGridSpec(
            num_scalar_prefetch=0,
            grid=grid,
            in_specs=in_specs,
            out_specs=pl.BlockSpec((tile_b, out_pad), lambda i: (i, 0)),
        ),
        compiler_params=pltpu.CompilerParams(
            dimension_semantics=("parallel",),
        ),
    )(x, *weight_operands)

    if slice_output:
        # Consumers that can handle the padded [padded_b, 128] bf16 logits
        # should pass slice_output=False to skip this extra HBM pass.
        out = out[:B, :class_num]
    return out


# ---------------------------------------------------------------------------
# References.
# ---------------------------------------------------------------------------
def reference_forward_bf16(x, prepared_params, class_num):
    """Same numerics as the kernel (bf16 operands, f32 accumulation)."""
    wb, bb, w1, b1, w2, b2, w3, b3 = prepared_params
    h = jnp.dot(x.astype(jnp.bfloat16), wb,
                preferred_element_type=jnp.float32) + bb
    h = jnp.maximum(h, 0.0).astype(jnp.bfloat16)
    h = jnp.dot(h, w1, preferred_element_type=jnp.float32) + b1
    h = jnp.maximum(h, 0.0).astype(jnp.bfloat16)
    h = jnp.dot(h, w2, preferred_element_type=jnp.float32) + b2
    h = jnp.maximum(h, 0.0).astype(jnp.bfloat16)
    out = jnp.dot(h, w3, preferred_element_type=jnp.float32) + b3
    return out[:, :class_num]


def reference_forward_f32(x, p, eps=1e-5):
    """Full-precision eval-mode AdvNet forward on the unfolded params."""
    h = x @ p["wb"] + p["bb"]
    scale = p["bn_gamma"] / jnp.sqrt(p["bn_var"] + eps)
    h = (h - p["bn_mean"]) * scale + p["bn_beta"]
    h = jnp.maximum(h, 0.0)
    h = jnp.maximum(h @ p["w1"] + p["b1"], 0.0)
    h = jnp.maximum(h @ p["w2"] + p["b2"], 0.0)
    return h @ p["w3"] + p["b3"]


if __name__ == "__main__":
    # Small shapes consistent with AdvNet(in_dim, bottleneck_dim, width, class_num).
    B, IN_DIM, BOTTLENECK, WIDTH, CLASS_NUM = 256, 128, 256, 256, 10

    key = jax.random.PRNGKey(0)
    kx, kp = jax.random.split(key)
    x = jax.random.normal(kx, (B, IN_DIM), jnp.float32)

    raw_params = init_params(kp, IN_DIM, BOTTLENECK, WIDTH, CLASS_NUM)
    params = prepare_params(raw_params)

    # Auto tile: 64 rows -> grid=(4,) (>=2 pipelined steps per v7x TensorCore,
    # no wrapper-side batch padding since 256 % 64 == 0).
    out = advnet_forward(x, params, CLASS_NUM)
    out = jax.block_until_ready(out)
    assert out.shape == (B, CLASS_NUM)
    out_f32 = out.astype(jnp.float32)

    # Check against a bf16-operand / f32-accum reference (same numerics, modulo
    # the final bf16 output rounding).
    ref_bf16 = reference_forward_bf16(x, params, CLASS_NUM)
    assert jnp.allclose(out_f32, ref_bf16, atol=1e-3, rtol=2e-2), "mismatch vs bf16 ref"

    # Sanity check against the full-precision eval-mode module (bf16 rounding only).
    ref_f32 = reference_forward_f32(x, raw_params)
    assert jnp.allclose(out_f32, ref_f32, atol=1e-3, rtol=5e-2), "mismatch vs f32 ref"

    # TODO(synk): grl_hook/calc_coeff gradient-reversal only affects the backward
    # pass (forward is identity) and Dropout/BatchNorm training-mode statistics
    # are not represented in this eval-mode forward kernel.
    print("KERNEL_OK")
</pallas_src>

<mosaic_0001>
module attributes {stable_mosaic.version = 11 : i64} {
  func.func @advnet_kernel(%arg0: i32, %arg1: memref<64x128xf32, #tpu.memory_space<vmem>>, %arg2: memref<128x256xbf16, #tpu.memory_space<vmem>>, %arg3: memref<1x256xf32, #tpu.memory_space<vmem>>, %arg4: memref<256x256xbf16, #tpu.memory_space<vmem>>, %arg5: memref<1x256xf32, #tpu.memory_space<vmem>>, %arg6: memref<256x128xbf16, #tpu.memory_space<vmem>>, %arg7: memref<1x128xf32, #tpu.memory_space<vmem>>, %arg8: memref<128x128xbf16, #tpu.memory_space<vmem>>, %arg9: memref<1x128xf32, #tpu.memory_space<vmem>>, %arg10: memref<64x128xbf16, #tpu.memory_space<vmem>>) attributes {dimension_semantics = [#tpu.dimension_semantics<parallel>], iteration_bounds = array<i64: 4>, scalar_prefetch = 0 : i64, scratch_operands = 0 : i64, tpu.core_type = #tpu.core_type<tc>, window_params = [{transform_indices = @transform_0, window_bounds = array<i64: 64, 128>}, {pipeline_mode = #tpu.pipeline_mode<synchronous>, transform_indices = @transform_1, window_bounds = array<i64: 128, 256>}, {pipeline_mode = #tpu.pipeline_mode<synchronous>, transform_indices = @transform_2, window_bounds = array<i64: 1, 256>}, {pipeline_mode = #tpu.pipeline_mode<synchronous>, transform_indices = @transform_3, window_bounds = array<i64: 256, 256>}, {pipeline_mode = #tpu.pipeline_mode<synchronous>, transform_indices = @transform_4, window_bounds = array<i64: 1, 256>}, {pipeline_mode = #tpu.pipeline_mode<synchronous>, transform_indices = @transform_5, window_bounds = array<i64: 256, 128>}, {pipeline_mode = #tpu.pipeline_mode<synchronous>, transform_indices = @transform_6, window_bounds = array<i64: 1, 128>}, {pipeline_mode = #tpu.pipeline_mode<synchronous>, transform_indices = @transform_7, window_bounds = array<i64: 128, 128>}, {pipeline_mode = #tpu.pipeline_mode<synchronous>, transform_indices = @transform_8, window_bounds = array<i64: 1, 128>}, {transform_indices = @transform_9, window_bounds = array<i64: 64, 128>}]} {
    %c0 = arith.constant 0 : index
    %c0_0 = arith.constant 0 : index
    %0 = vector.load %arg1[%c0, %c0_0] : memref<64x128xf32, #tpu.memory_space<vmem>>, vector<64x128xf32>
    %1 = arith.truncf %0 : vector<64x128xf32> to vector<64x128xbf16>
    %c0_1 = arith.constant 0 : index
    %c0_2 = arith.constant 0 : index
    %2 = vector.load %arg2[%c0_1, %c0_2] : memref<128x256xbf16, #tpu.memory_space<vmem>>, vector<128x256xbf16>
    %cst = arith.constant dense<0.000000e+00> : vector<64x256xf32>
    %3 = tpu.matmul %1, %2, %cst {dimension_numbers = #tpu.dot_dimension_numbers<[1], [0], [0], [1], [0, 0, 1, 1], [], []>} : vector<64x128xbf16>, vector<128x256xbf16>, vector<64x256xf32> -> vector<64x256xf32>
    %c0_3 = arith.constant 0 : index
    %c0_4 = arith.constant 0 : index
    %4 = vector.load %arg3[%c0_3, %c0_4] : memref<1x256xf32, #tpu.memory_space<vmem>>, vector<1x256xf32>
    %5 = vector.broadcast %4 : vector<1x256xf32> to vector<64x256xf32>
    %6 = arith.addf %3, %5 : vector<64x256xf32>
    %cst_5 = arith.constant 0.000000e+00 : f32
    %7 = vector.broadcast %cst_5 : f32 to vector<64x256xf32>
    %8 = arith.maximumf %6, %7 : vector<64x256xf32>
    %9 = arith.truncf %8 : vector<64x256xf32> to vector<64x256xbf16>
    %c0_6 = arith.constant 0 : index
    %c0_7 = arith.constant 0 : index
    %10 = vector.load %arg4[%c0_6, %c0_7] : memref<256x256xbf16, #tpu.memory_space<vmem>>, vector<256x256xbf16>
    %cst_8 = arith.constant dense<0.000000e+00> : vector<64x256xf32>
    %11 = tpu.matmul %9, %10, %cst_8 {dimension_numbers = #tpu.dot_dimension_numbers<[1], [0], [0], [1], [0, 0, 1, 1], [], []>} : vector<64x256xbf16>, vector<256x256xbf16>, vector<64x256xf32> -> vector<64x256xf32>
    %c0_9 = arith.constant 0 : index
    %c0_10 = arith.constant 0 : index
    %12 = vector.load %arg5[%c0_9, %c0_10] : memref<1x256xf32, #tpu.memory_space<vmem>>, vector<1x256xf32>
    %13 = vector.broadcast %12 : vector<1x256xf32> to vector<64x256xf32>
    %14 = arith.addf %11, %13 : vector<64x256xf32>
    %cst_11 = arith.constant 0.000000e+00 : f32
    %15 = vector.broadcast %cst_11 : f32 to vector<64x256xf32>
    %16 = arith.maximumf %14, %15 : vector<64x256xf32>
    %17 = arith.truncf %16 : vector<64x256xf32> to vector<64x256xbf16>
    %c0_12 = arith.constant 0 : index
    %c0_13 = arith.constant 0 : index
    %18 = vector.load %arg6[%c0_12, %c0_13] : memref<256x128xbf16, #tpu.memory_space<vmem>>, vector<256x128xbf16>
    %cst_14 = arith.constant dense<0.000000e+00> : vector<64x128xf32>
    %19 = tpu.matmul %17, %18, %cst_14 {dimension_numbers = #tpu.dot_dimension_numbers<[1], [0], [0], [1], [0, 0, 1, 1], [], []>} : vector<64x256xbf16>, vector<256x128xbf16>, vector<64x128xf32> -> vector<64x128xf32>
    %c0_15 = arith.constant 0 : index
    %c0_16 = arith.constant 0 : index
    %20 = vector.load %arg7[%c0_15, %c0_16] : memref<1x128xf32, #tpu.memory_space<vmem>>, vector<1x128xf32>
    %21 = vector.broadcast %20 : vector<1x128xf32> to vector<64x128xf32>
    %22 = arith.addf %19, %21 : vector<64x128xf32>
    %cst_17 = arith.constant 0.000000e+00 : f32
    %23 = vector.broadcast %cst_17 : f32 to vector<64x128xf32>
    %24 = arith.maximumf %22, %23 : vector<64x128xf32>
    %25 = arith.truncf %24 : vector<64x128xf32> to vector<64x128xbf16>
    %c0_18 = arith.constant 0 : index
    %c0_19 = arith.constant 0 : index
    %26 = vector.load %arg8[%c0_18, %c0_19] : memref<128x128xbf16, #tpu.memory_space<vmem>>, vector<128x128xbf16>
    %cst_20 = arith.constant dense<0.000000e+00> : vector<64x128xf32>
    %27 = tpu.matmul %25, %26, %cst_20 {dimension_numbers = #tpu.dot_dimension_numbers<[1], [0], [0], [1], [0, 0, 1, 1], [], []>} : vector<64x128xbf16>, vector<128x128xbf16>, vector<64x128xf32> -> vector<64x128xf32>
    %c0_21 = arith.constant 0 : index
    %c0_22 = arith.constant 0 : index
    %28 = vector.load %arg9[%c0_21, %c0_22] : memref<1x128xf32, #tpu.memory_space<vmem>>, vector<1x128xf32>
    %29 = vector.broadcast %28 : vector<1x128xf32> to vector<64x128xf32>
    %30 = arith.addf %27, %29 : vector<64x128xf32>
    %31 = arith.truncf %30 : vector<64x128xf32> to vector<64x128xbf16>
    %c0_23 = arith.constant 0 : index
    %c0_24 = arith.constant 0 : index
    %32 = vector.load %arg10[%c0_23, %c0_24] : memref<64x128xbf16, #tpu.memory_space<vmem>>, vector<64x128xbf16>
    tpu.vector_store %arg10[%c0_23, %c0_24], %31 {strides = array<i32>} : memref<64x128xbf16, #tpu.memory_space<vmem>>, vector<64x128xbf16>,
    return
  }
  func.func @transform_0(%arg0: i32) -> (i32, i32) {
    %c0_i32 = arith.constant 0 : i32
    %c0_i32_0 = arith.constant 0 : i32
    return %arg0, %c0_i32 : i32, i32
  }
  func.func @transform_1(%arg0: i32) -> (i32, i32) {
    %c0_i32 = arith.constant 0 : i32
    %c0_i32_0 = arith.constant 0 : i32
    %c0_i32_1 = arith.constant 0 : i32
    return %c0_i32, %c0_i32_0 : i32, i32
  }
  func.func @transform_2(%arg0: i32) -> (i32, i32) {
    %c0_i32 = arith.constant 0 : i32
    %c0_i32_0 = arith.constant 0 : i32
    %c0_i32_1 = arith.constant 0 : i32
    return %c0_i32, %c0_i32_0 : i32, i32
  }
  func.func @transform_3(%arg0: i32) -> (i32, i32) {
    %c0_i32 = arith.constant 0 : i32
    %c0_i32_0 = arith.constant 0 : i32
    %c0_i32_1 = arith.constant 0 : i32
    return %c0_i32, %c0_i32_0 : i32, i32
  }
  func.func @transform_4(%arg0: i32) -> (i32, i32) {
    %c0_i32 = arith.constant 0 : i32
    %c0_i32_0 = arith.constant 0 : i32
    %c0_i32_1 = arith.constant 0 : i32
    return %c0_i32, %c0_i32_0 : i32, i32
  }
  func.func @transform_5(%arg0: i32) -> (i32, i32) {
    %c0_i32 = arith.constant 0 : i32
    %c0_i32_0 = arith.constant 0 : i32
    %c0_i32_1 = arith.constant 0 : i32
    return %c0_i32, %c0_i32_0 : i32, i32
  }
  func.func @transform_6(%arg0: i32) -> (i32, i32) {
    %c0_i32 = arith.constant 0 : i32
    %c0_i32_0 = arith.constant 0 : i32
    %c0_i32_1 = arith.constant 0 : i32
    return %c0_i32, %c0_i32_0 : i32, i32
  }
  func.func @transform_7(%arg0: i32) -> (i32, i32) {
    %c0_i32 = arith.constant 0 : i32
    %c0_i32_0 = arith.constant 0 : i32
    %c0_i32_1 = arith.constant 0 : i32
    return %c0_i32, %c0_i32_0 : i32, i32
  }
  func.func @transform_8(%arg0: i32) -> (i32, i32) {
    %c0_i32 = arith.constant 0 : i32
    %c0_i32_0 = arith.constant 0 : i32
    %c0_i32_1 = arith.constant 0 : i32
    return %c0_i32, %c0_i32_0 : i32, i32
  }
  func.func @transform_9(%arg0: i32) -> (i32, i32) {
    %c0_i32 = arith.constant 0 : i32
    %c0_i32_0 = arith.constant 0 : i32
    return %arg0, %c0_i32 : i32, i32
  }
}

</mosaic_0001>

<bundles_post_ra>
// kernel: tpu_custom_call.1
= control target key start
LH: loop header
LB: loop body
LE: loop exit
PB: predicated region body
PF: predicated region fallthrough
CT: control target
= control target key end

     0   :  { %s2469_s0 = inlined_call_operand.hbm [shape: f32[256,128], index: 0, kind: input, shape index: {}]   ;;  %s2470_s1 = inlined_call_operand.hbm [shape: bf16[128,256], index: 1, kind: input, shape index: {}]   ;;  %s2471_s2 = inlined_call_operand.vmem [shape: f32[1,256], index: 2, kind: input, shape index: {}]   ;;  %s2472_s3 = inlined_call_operand.hbm [shape: bf16[256,256], index: 3, kind: input, shape index: {}]   ;;  %s2473_s4 = inlined_call_operand.vmem [shape: f32[1,256], index: 4, kind: input, shape index: {}]   ;;  %s2474_s5 = inlined_call_operand.hbm [shape: bf16[256,128], index: 5, kind: input, shape index: {}]   ;;  %s2475_s6 = inlined_call_operand.vmem [shape: f32[1,128], index: 6, kind: input, shape index: {}]   ;;  %s2476_s7 = inlined_call_operand.hbm [shape: bf16[128,128], index: 7, kind: input, shape index: {}]   ;;  %s2477_s8 = inlined_call_operand.vmem [shape: f32[1,128], index: 8, kind: input, shape index: {}]   ;;  %s2478_s9 = inlined_call_operand.hbm [shape: bf16[256,128], index: 9, kind: output, shape index: {}]  }
   0x1   :  { %2489 = sst [smem:[#allocation18_spill]] %s2470_s1 }
   0x2   :  { %14 = vsyncpa [#allocation3], 0 }
   0x3   :  { %16 = vsyncpa [#allocation3 + $0x1], 0 }
   0x4   :  { %17 = vsyncpa [#allocation6], 0 }
   0x5   :  { %18 = vsyncpa [#allocation9], 0 }
   0x6   :  { %19 = vsyncpa [#allocation4], 0 }
   0x7   :  { %21 = vsyncpa [#allocation4 + $0x1], 0  ;;  %s2143_s30 = smov 0   ;;  %s2145_s10 = smov 0  }
   0x8   :  { %s2147_s11 = smov 0   ;;  %s2149_s12 = smov 0  }
   0x9 LB: > { %2490 = sst [smem:[#allocation16_spill]] %s2066_s30  ;;  %s2164_s13 = sadd.s32 4294967295, %s2078_s12   ;;  %s2078_s12 = sphi %s2149_s12, %s2516_s12   ;;  %s2074_s11 = sphi %s2147_s11, %s2515_s11   ;;  %s2070_s10 = sphi %s2145_s10, %s2514_s10   ;;  %s2066_s30 = sphi %s2143_s30, %s2513_s30  }
   0xa   : > { %s1443_s14 = sadd.s32 4294967294, %s2078_s12   ;;  %p47_p0 = scmp.ne.s32.totalorder %s2070_s10, %s2066_s30 }
   0xb   : > { %p2479_p1 = scmp.eq.s32.totalorder %s2164_s13, 0  ;;  %p245_p3 = scmp.eq.s32.totalorder %s1443_s14, 3 }
   0xc   : > { %p1444_p5 = scmp.ge.s32.totalorder %s2078_s12, 1  ;;  %p252_p7 = scmp.lt.s32.totalorder %s2078_s12, 5 }
   0xd   : > { %p2173_p4 = por %p2479_p1, %p47_p0  ;;  %p2178_p6 = por %p245_p3, %p47_p0 }
   0xe   : > { %p2183_p8 = pnand %p1444_p5, %p252_p7  ;;  %s2080_s18 = smov [#allocation5]  }
   0xf   : > { %s2491_s15 = scalar_select %p2173_p4, 1, 0 }
  0x10   : > { %s2492_s16 = scalar_select %p2178_p6, 1, 0 }
  0x11   : > { %s2494_s17 = scalar_select %p2183_p8, 1, 0 }
  0x12   : > { %2493 = sst [smem:[#allocation17_spill]] %s2492_s16  ;;  %s264_s19 = sshll.u32 %s2080_s18, 4  ;;  %s265_s19 = int_to_ptr.vmem [resolvable:$true] %s264_s19 }
  0x13   : > { %p1692_p9 = pneg %p2183_p8  ;;  %s2081_s21 = smov [#allocation8]  }
  0x14   : > { %s296_s22 = sshll.u32 %s2081_s21, 4  ;;  %s2496_s1 = sld [smem:[#allocation18_spill]]  ;;  %s2195_s22 = int_to_ptr.vmem [resolvable:$true] %s296_s22 }
  0x15   : > { %p2191_p10 = pnand %p1692_p9, %p2479_p1 }
  0x17   : > { %p2205_p12 = pneg %p2191_p10 }
  0x1a   : > { %s1862_s25 = scalar_lea.hbm %s2496_s1, 2048 }
  0x1b   : > { %p1863_p11 = scmp.ne.s32.totalorder %s2496_s1, %s1862_s25  ;;  %p1869_p3 = scmp.lt.u32.totalorder %s1862_s25, %s2496_s1 }
  0x1d   : > { %p1865_p13 = pnand %p2205_p12, %p1863_p11 }
  0x1f   : > { %p1866_p0 = pneg %p1865_p13 }
  0x21   : > { %p1871_p5 = pnand %p1869_p3, %p1866_p0 }
  0x23   : > { %1874 = shalt.err (!%p1871_p5)
}
  0x24   : > { %s1875_s18 = scalar_lea.vmem %s265_s19, 2048  ;;  %p1883_p2 = scmp.lt.s32.totalorder %s265_s19, %s265_s19 }
  0x25   : > { %p1876_p7 = scmp.ne.s32.totalorder %s265_s19, %s1875_s18  ;;  %p1884_p6 = scmp.lt.s32.totalorder %s1875_s18, %s1875_s18 }
  0x27   : > { %p1878_p9 = pnand %p1876_p7, %p2205_p12  ;;  %p1885_p4 = por %p1884_p6, %p1883_p2 }
  0x29   : > { %p1879_p1 = pneg %p1878_p9 }
  0x2b   : > { %p1886_p8 = pnand %p1885_p4, %p1879_p1 }
  0x2d   : > { %1889 = shalt.err (!%p1886_p8)
}
  0x2e   : > { %s2484_s21 = smov 128   ;;  %s2486_s23 = smov 8  }
  0x2f   : > { %1695 = dma.hbm_to_vmem [thread:$0]  (!%p2191_p10), %s2496_s1, 2048, %s265_s19, [#allocation6], %s2484_s21, %s2484_s21, %s2486_s23  }
  0x30   : > { %s1890_s29 = scalar_lea.hbm %s2474_s5, 2048 }
  0x31   : > { %p1891_p1 = scmp.ne.s32.totalorder %s2474_s5, %s1890_s29  ;;  %p1897_p6 = scmp.lt.u32.totalorder %s1890_s29, %s2474_s5 }
  0x33   : > { %p1893_p2 = pnand %p1891_p1, %p2205_p12 }
  0x35   : > { %p1894_p4 = pneg %p1893_p2 }
  0x37   : > { %p1899_p8 = pnand %p1897_p6, %p1894_p4 }
  0x39   : > { %1902 = shalt.err (!%p1899_p8)
}
  0x3a   : > { %s1903_s19 = scalar_lea.vmem %s2195_s22, 2048  ;;  %p1911_p3 = scmp.lt.s32.totalorder %s2195_s22, %s2195_s22 }
  0x3b   : > { %p1904_p11 = scmp.ne.s32.totalorder %s2195_s22, %s1903_s19  ;;  %p1912_p5 = scmp.lt.s32.totalorder %s1903_s19, %s1903_s19 }
  0x3d   : > { %p1906_p13 = pnand %p1904_p11, %p2205_p12  ;;  %p1913_p7 = por %p1912_p5, %p1911_p3 }
  0x3f   : > { %p1907_p0 = pneg %p1906_p13 }
  0x41   : > { %p1914_p9 = pnand %p1913_p7, %p1907_p0 }
  0x43   : > { %1917 = shalt.err (!%p1914_p9)
}
  0x44   : > { %s2488_s24 = smov 64   ;;  %s2085_s30 = smov 4  }
  0x45   : > { %1701 = dma.hbm_to_vmem [thread:$0]  (!%p2191_p10), %s2474_s5, 2048, %s2195_s22, [#allocation9], %s2488_s24, %s2488_s24, %s2085_s30  }
  0x46   : > { %s2086_s26 = smov [#allocation7]   ;;  %s2087_s29 = smov [#allocation10]  }
  0x47   : > { %s280_s27 = sshll.u32 %s2086_s26, 4  ;;  %s312_s14 = sshll.u32 %s2087_s29, 4  ;;  %s281_s27 = int_to_ptr.vmem [resolvable:$true] %s280_s27  ;;  %s2250_s14 = int_to_ptr.vmem [resolvable:$true] %s312_s14 }
  0x48   : > { %s1918_s21 = scalar_lea.hbm %s2472_s3, 4096 }
  0x49   : > { %p1919_p1 = scmp.ne.s32.totalorder %s2472_s3, %s1918_s21  ;;  %p1925_p6 = scmp.lt.u32.totalorder %s1918_s21, %s2472_s3 }
  0x4b   : > { %p1921_p2 = pnand %p1919_p1, %p2205_p12 }
  0x4d   : > { %p1922_p4 = pneg %p1921_p2 }
  0x4f   : > { %p1927_p8 = pnand %p1925_p6, %p1922_p4 }
  0x51   : > { %1930 = shalt.err (!%p1927_p8)
}
  0x52   : > { %s1931_s25 = scalar_lea.vmem %s281_s27, 4096  ;;  %p1939_p3 = scmp.lt.s32.totalorder %s281_s27, %s281_s27 }
  0x53   : > { %p1932_p11 = scmp.ne.s32.totalorder %s281_s27, %s1931_s25  ;;  %p1940_p5 = scmp.lt.s32.totalorder %s1931_s25, %s1931_s25 }
  0x55   : > { %p1934_p13 = pnand %p1932_p11, %p2205_p12  ;;  %p1941_p7 = por %p1940_p5, %p1939_p3 }
  0x57   : > { %p1935_p0 = pneg %p1934_p13 }
  0x59   : > { %p1942_p9 = pnand %p1941_p7, %p1935_p0 }
  0x5b   : > { %1945 = shalt.err (!%p1942_p9)
}
  0x5c   : > { %s2498_s1 = smov 8   ;;  %s2499_s23 = smov 128  }
  0x5d   : > { %1698 = dma.hbm_to_vmem [thread:$0]  (!%p2191_p10), %s2472_s3, 4096, %s281_s27, [#allocation6], %s2499_s23, %s2499_s23, %s2498_s1  }
  0x5e   : > { %s1946_s19 = scalar_lea.hbm %s2476_s7, 1024 }
  0x5f   : > { %p1947_p1 = scmp.ne.s32.totalorder %s2476_s7, %s1946_s19  ;;  %p1953_p6 = scmp.lt.u32.totalorder %s1946_s19, %s2476_s7 }
  0x61   : > { %p1949_p2 = pnand %p1947_p1, %p2205_p12 }
  0x63   : > { %p1950_p4 = pneg %p1949_p2 }
  0x65   : > { %p1955_p8 = pnand %p1953_p6, %p1950_p4 }
  0x67   : > { %1958 = shalt.err (!%p1955_p8)
}
  0x68   : > { %s1959_s27 = scalar_lea.vmem %s2250_s14, 1024  ;;  %p1967_p3 = scmp.lt.s32.totalorder %s2250_s14, %s2250_s14 }
  0x69   : > { %p1960_p11 = scmp.ne.s32.totalorder %s2250_s14, %s1959_s27  ;;  %p1968_p5 = scmp.lt.s32.totalorder %s1959_s27, %s1959_s27 }
  0x6b   : > { %p1962_p13 = pnand %p1960_p11, %p2205_p12  ;;  %p1969_p7 = por %p1968_p5, %p1967_p3 }
  0x6d   : > { %p1963_p0 = pneg %p1962_p13 }
  0x6f   : > { %p1970_p9 = pnand %p1969_p7, %p1963_p0 }
  0x71   : > { %1973 = shalt.err (!%p1970_p9)
}
  0x72   : > { %s2500_s24 = smov 64   ;;  %s2300_s20 = sadd.s32 1, %s2078_s12  }
  0x73   : > { %1704 = dma.hbm_to_vmem [thread:$0]  (!%p2191_p10), %s2476_s7, 1024, %s2250_s14, [#allocation9], %s2500_s24, %s2500_s24, %s2085_s30  }
  0x74   : > { %s31_s28 = ssub.s32 %s2078_s12, %s2300_s20  ;;  %s34_s29 = sadd.s32 1, %s2074_s11 }
  0x75   : > { %p32_p12 = scmp.eq.s32.totalorder %s31_s28, 0  ;;  %p41_p1 = scmp.ne.s32.totalorder %s2074_s11, %s2070_s10 }
  0x76   : > { %p42_p2 = scmp.eq.s32.totalorder %s2078_s12, 0  ;;  %p2501_p6 = scmp.eq.s32.totalorder %s2164_s13, 3 }
  0x77   : > { %s2309_s18 = scalar_select %p32_p12, %s2074_s11, %s34_s29  }
  0x78   : > { %p43_p4 = por %p42_p2, %p41_p1  ;;  %p2313_p8 = por %p2501_p6, %p41_p1 }
  0x79   : > { %p1717_p11 = scmp.lt.s32.totalorder %s2078_s12, 4  ;;  %s329_s16 = sand.u32 1, %s2074_s11  }
  0x7a   : > { %s1450_s22 = sshll.u32 %s329_s16, 6  ;;  %s1547_s30 = sshll.u32 %s2078_s12, 10 }
  0x7b   : > { %s2323_s27 = scalar_lea.hbm %s2469_s0, %s1547_s30  ;;  %s333_s24 = scalar_lea.vmem [#allocation2], %s1450_s22 }
  0x7c   : > { %s340_s26 = sshll.u32 %s333_s24, 4  ;;  %p2327_p10 = pnand %p1717_p11, %p43_p4  ;;  %s2325_s26 = int_to_ptr.vmem [resolvable:$true] %s340_s26 }
  0x7d   : > { %s2331_s28 = scalar_lea.sflag [#allocation3], %s329_s16  ;;  %s1974_s29 = scalar_lea.hbm %s2323_s27, 1024 }
  0x7e   : > { %p1975_p13 = scmp.ne.s32.totalorder %s2323_s27, %s1974_s29  ;;  %p1976_p0 = pneg %p2327_p10 }
  0x7f   : > { %s1979_s14 = scalar_lea.hbm %s2469_s0, 4096  ;;  %p1980_p7 = scmp.lt.u32.totalorder %s2323_s27, %s2469_s0 }
  0x80   : > { %p1977_p3 = pnand %p1976_p0, %p1975_p13  ;;  %p1981_p9 = scmp.lt.u32.totalorder %s1979_s14, %s1974_s29 }
  0x81   : > { %p1983_p1 = scmp.lt.u32.totalorder %s1974_s29, %s2323_s27 }
  0x82   : > { %p1978_p5 = pneg %p1977_p3  ;;  %p1982_p12 = por %p1981_p9, %p1980_p7 }
  0x84   : > { %p1984_p2 = por %p1983_p1, %p1982_p12 }
  0x86   : > { %p1985_p4 = pnand %p1984_p2, %p1978_p5 }
  0x88   : > { %1988 = shalt.err (!%p1985_p4)
}
  0x89   : > { %s1989_s16 = scalar_lea.vmem %s2325_s26, 1024  ;;  %s2088_s22 = smov [#allocation2]  }
  0x8a   : > { %p1990_p6 = scmp.ne.s32.totalorder %s2325_s26, %s1989_s16  ;;  %s1994_s30 = sshll.u32 %s2088_s22, 4  ;;  %s1995_s30 = int_to_ptr.vmem [resolvable:$false] %s1994_s30 }
  0x8b   : > { %s1996_s25 = scalar_lea.vmem %s1995_s30, 2048  ;;  %p1997_p3 = scmp.lt.s32.totalorder %s2325_s26, %s1995_s30 }
  0x8c   : > { %p1992_p11 = pnand %p1990_p6, %p1976_p0  ;;  %p1998_p7 = scmp.lt.s32.totalorder %s1996_s25, %s1989_s16 }
  0x8e   : > { %p1993_p13 = pneg %p1992_p11  ;;  %p1999_p9 = por %p1998_p7, %p1997_p3 }
  0x90   : > { %p2000_p12 = pnand %p1999_p9, %p1993_p13 }
  0x92   : > { %2003 = shalt.err (!%p2000_p12)
}
  0x93   : > { %1708 = dma.hbm_to_vmem [thread:$0]  (!%p2327_p10), %s2323_s27, 1024, %s2325_s26, %s2331_s28, %s2499_s23, %s2499_s23, %s2498_s1  }
  0x94   : > { %p2504_p0 = scmp.ne.s32.totalorder %s2494_s17, 0 }
  0x95   : > { %s2365_s29 = sand.u32 (!%p2504_p0), 1, %s2070_s10   ;;  %p2505_p5 = scmp.ne.s32.totalorder (!%p2504_p0), %s2491_s15, 0 }
  0x96   : > { %352 = sbr.rel (%p2504_p0) target bundleno = 1123 (0x463), region = 56  ;;  %s1454_s14 = sshll.u32 (!%p2504_p0), %s2365_s29, 6 }
  0x97   : > { %s355_s24 = scalar_lea.sflag (!%p2504_p0), [#allocation3], %s2365_s29  ;;  %s2369_s16 = scalar_lea.vmem (!%p2504_p0), [#allocation2], %s1454_s14 }
  0x9d   : > { %2049 = dma.done.wait (%p2505_p5), %s355_s24, 1024  }
  0x9e   : > { %2051 = vsyncadd (%p2505_p5), %s355_s24, 4294966272  ;;  %p2506_p10 = scmp.eq.s32.totalorder %s2164_s13, 0 }
  0xa0   : > { %2053 = dma.done.wait (%p2506_p10), [#allocation6], 6144   ;;  %p2507_p1 = pmov %p2506_p10 }
  0xa2   : > { %2055 = vsyncadd (%p2507_p1), [#allocation6], 4294961152  ;;  %p2508_p2 = pmov %p2507_p1 }
  0xa3   : > { %p2509_p4 = pmov %p2507_p1 }
  0xa4   : > { %2057 = dma.done.wait (%p2508_p2), [#allocation9], 3072  }
  0xa5   : > { %2059 = vsyncadd (%p2509_p4), [#allocation9], 4294964224  ;;  %v2089_v0 = vmov 0   ;;  %v1766_v1 = vld [vmem:[#allocation5 + $0x4] ss:$8 sps:$4 sm:$0xff]   ;;  %v414_v33 = vld [vmem:[%s2369_s16 + $0x10] sm:$0xff] }
  0xa6   : > { %564 = vmatprep.mubr.bf16.mxu0 %v2089_v0  ;;  %v1768_v2 = vld [vmem:[#allocation5] ss:$8 sps:$4 sm:$0xff]   ;;  %532 = vmatprep.subr.bf16.mxu0 %v1766_v1  ;;  %v1769_v3 = vld [vmem:[#allocation5 + $0x14] ss:$8 sps:$4 sm:$0xff]   ;;  %v1771_v4 = vld [vmem:[#allocation5 + $0x10] ss:$8 sps:$4 sm:$0xff]  }
  0xa7   : > { %533 = vmatpush1.bf16.msra.mxu0 %v1768_v2  ;;  %v1772_v5 = vld [vmem:[#allocation5 + $0x24] ss:$8 sps:$4 sm:$0xff]   ;;  %v1774_v6 = vld [vmem:[#allocation5 + $0x20] ss:$8 sps:$4 sm:$0xff]   ;;  %v1775_v7 = vld [vmem:[#allocation5 + $0x34] ss:$8 sps:$4 sm:$0xff]  }
  0xa8   : > { %534 = vmatprep.subr.bf16.mxu0 %v1769_v3  ;;  %v1777_v8 = vld [vmem:[#allocation5 + $0x30] ss:$8 sps:$4 sm:$0xff]   ;;  %v1778_v9 = vld [vmem:[#allocation5 + $0x44] ss:$8 sps:$4 sm:$0xff]   ;;  %v1792_v11 = vld [vmem:[#allocation7] ss:$8 sps:$4 sm:$0xff]  }
  0xa9   : > { %v1790_v10 = vld [vmem:[#allocation7 + $0x4] ss:$8 sps:$4 sm:$0xff]   ;;  %v1780_v12 = vld [vmem:[#allocation5 + $0x40] ss:$8 sps:$4 sm:$0xff]   ;;  %v1793_v13 = vld [vmem:[#allocation7 + $0x14] ss:$8 sps:$4 sm:$0xff]  }
  0xaa   : > { %v1781_v14 = vld [vmem:[#allocation5 + $0x54] ss:$8 sps:$4 sm:$0xff]   ;;  %833 = vmatprep.subr.bf16.mxu1 %v1790_v10  ;;  %v1795_v15 = vld [vmem:[#allocation7 + $0x10] ss:$8 sps:$4 sm:$0xff]   ;;  %v1796_v16 = vld [vmem:[#allocation7 + $0x24] ss:$8 sps:$4 sm:$0xff]  }
  0xab   : > { %535 = vmatpush1.bf16.msra.mxu0 %v1771_v4  ;;  %834 = vmatpush1.bf16.msra.mxu1 %v1792_v11  ;;  %v1783_v17 = vld [vmem:[#allocation5 + $0x50] ss:$8 sps:$4 sm:$0xff]   ;;  %v1784_v18 = vld [vmem:[#allocation5 + $0x64] ss:$8 sps:$4 sm:$0xff]   ;;  %v1798_v19 = vld [vmem:[#allocation7 + $0x20] ss:$8 sps:$4 sm:$0xff]  }
  0xac   : > { %536 = vmatprep.subr.bf16.mxu0 %v1772_v5  ;;  %835 = vmatprep.subr.bf16.mxu1 %v1793_v13  ;;  %v1799_v20 = vld [vmem:[#allocation7 + $0x34] ss:$8 sps:$4 sm:$0xff]   ;;  %v1786_v21 = vld [vmem:[#allocation5 + $0x60] ss:$8 sps:$4 sm:$0xff]   ;;  %v1801_v23 = vld [vmem:[#allocation7 + $0x30] ss:$8 sps:$4 sm:$0xff]  }
  0xad   : > { %v1787_v22 = vld [vmem:[#allocation5 + $0x74] ss:$8 sps:$4 sm:$0xff]   ;;  %v1789_v24 = vld [vmem:[#allocation5 + $0x70] ss:$8 sps:$4 sm:$0xff]   ;;  %v1802_v25 = vld [vmem:[#allocation7 + $0x44] ss:$8 sps:$4 sm:$0xff]  }
  0xae   : > { %v412_v26 = vld [vmem:[%s2369_s16] sm:$0xff]  ;;  %v413_v27 = vld [vmem:[%s2369_s16 + $0x8] sm:$0xff]  ;;  %v1805_v30 = vld [vmem:[#allocation7 + $0x54] ss:$8 sps:$4 sm:$0xff]   ;;  %s1459_s22 = sshll.u32 %s2365_s29, 5  ;;  %s1556_s14 = sshll.u32 %s2164_s13, 9 }
  0xaf   : > { %537 = vmatpush1.bf16.msra.mxu0 %v1774_v6  ;;  %836 = vmatpush1.bf16.msra.mxu1 %v1795_v15  ;;  %v1804_v28 = vld [vmem:[#allocation7 + $0x40] ss:$8 sps:$4 sm:$0xff]   ;;  %v420_v29 = vpack.c.bf16 %v413_v27, %v412_v26  ;;  %v1807_v31 = vld [vmem:[#allocation7 + $0x50] ss:$8 sps:$4 sm:$0xff]   ;;  %v1808_v32 = vld [vmem:[#allocation7 + $0x64] ss:$8 sps:$4 sm:$0xff]   ;;  %s2426_s15 = scalar_lea.hbm %s2478_s9, %s1556_s14 }
  0xb0   : > { %538 = vmatprep.subr.bf16.mxu0 %v1775_v7  ;;  %837 = vmatprep.subr.bf16.mxu1 %v1796_v16  ;;  %v415_v34 = vld [vmem:[%s2369_s16 + $0x18] sm:$0xff]  ;;  %v1810_v35 = vld [vmem:[#allocation7 + $0x60] ss:$8 sps:$4 sm:$0xff]   ;;  %v1814_v39 = vld [vmem:[#allocation7 + $0x84] ss:$8 sps:$4 sm:$0xff]   ;;  %s408_s30 = scalar_lea.vmem [#allocation11], %s1459_s22 }
  0xb1   : > { %v1811_v36 = vld [vmem:[#allocation7 + $0x74] ss:$8 sps:$4 sm:$0xff]   ;;  %v421_v37 = vpack.c.bf16 %v415_v34, %v414_v33  ;;  %v1813_v38 = vld [vmem:[#allocation7 + $0x70] ss:$8 sps:$4 sm:$0xff]   ;;  %v416_v40 = vld [vmem:[%s2369_s16 + $0x20] sm:$0xff]  ;;  %s1332_s25 = sshll.u32 %s408_s30, 4  ;;  %s2421_s25 = int_to_ptr.vmem [resolvable:$true] %s1332_s25 }
  0xb2   : > { %v417_v41 = vld [vmem:[%s2369_s16 + $0x28] sm:$0xff]  ;;  %v1817_v43 = vld [vmem:[#allocation7 + $0x94] ss:$8 sps:$4 sm:$0xff]   ;;  %v1819_v45 = vld [vmem:[#allocation7 + $0x90] ss:$8 sps:$4 sm:$0xff]   ;;  %s1319_s13 = scalar_lea.sflag [#allocation4], %s2365_s29 }
  0xb3   : > { %539 = vmatpush1.bf16.msra.mxu0 %v1777_v8  ;;  %838 = vmatpush1.bf16.msra.mxu1 %v1798_v19  ;;  %v1816_v42 = vld [vmem:[#allocation7 + $0x80] ss:$8 sps:$4 sm:$0xff]   ;;  %v422_v44 = vpack.c.bf16 %v417_v41, %v416_v40  ;;  %v1820_v46 = vld [vmem:[#allocation7 + $0xa4] ss:$8 sps:$4 sm:$0xff]   ;;  %v418_v47 = vld [vmem:[%s2369_s16 + $0x30] sm:$0xff]  ;;  %s2004_s17 = scalar_lea.vmem %s2421_s25, 512 }
  0xb4   : > { %540 = vmatprep.subr.bf16.mxu0 %v1778_v9  ;;  %839 = vmatprep.subr.bf16.mxu1 %v1799_v20  ;;  %v419_v48 = vld [vmem:[%s2369_s16 + $0x38] sm:$0xff]  ;;  %v1822_v49 = vld [vmem:[#allocation7 + $0xa0] ss:$8 sps:$4 sm:$0xff]   ;;  %v1826_v53 = vld [vmem:[#allocation7 + $0xc4] ss:$8 sps:$4 sm:$0xff]   ;;  %v442_v9 = vlaneseq  ;;  %p2005_p6 = scmp.ne.s32.totalorder %s2421_s25, %s2004_s17  ;;  %s2090_s1 = smov [#allocation11]  }
  0xb5   : > { %v423_v50 = vpack.c.bf16 %v419_v48, %v418_v47  ;;  %v1823_v51 = vld [vmem:[#allocation7 + $0xb4] ss:$8 sps:$4 sm:$0xff]   ;;  %v1825_v52 = vld [vmem:[#allocation7 + $0xb0] ss:$8 sps:$4 sm:$0xff]   ;;  %v1828_v54 = vld [vmem:[#allocation7 + $0xc0] ss:$8 sps:$4 sm:$0xff]  }
  0xb6   : > { %v1829_v55 = vld [vmem:[#allocation7 + $0xd4] ss:$8 sps:$4 sm:$0xff]   ;;  %v1831_v56 = vld [vmem:[#allocation7 + $0xd0] ss:$8 sps:$4 sm:$0xff]   ;;  %v1832_v57 = vld [vmem:[#allocation7 + $0xe4] ss:$8 sps:$4 sm:$0xff]   ;;  %p2006_p11 = pnand %p2005_p6, %p2313_p8 }
  0xb7   : > { %541 = vmatpush1.bf16.msra.mxu0 %v1780_v12  ;;  %840 = vmatpush1.bf16.msra.mxu1 %v1801_v23  ;;  %v1834_v58 = vld [vmem:[#allocation7 + $0xe0] ss:$8 sps:$4 sm:$0xff]   ;;  %v1835_v59 = vld [vmem:[#allocation7 + $0xf4] ss:$8 sps:$4 sm:$0xff]   ;;  %v1837_v60 = vld [vmem:[#allocation7 + $0xf0] ss:$8 sps:$4 sm:$0xff]  }
  0xb8   : > { %542 = vmatprep.subr.bf16.mxu0 %v1781_v14  ;;  %841 = vmatprep.subr.bf16.mxu1 %v1802_v25  ;;  %v1838_v61 = vld [vmem:[#allocation8 + $0x40] sm:$0xff]   ;;  %v1840_v63 = vld [vmem:[#allocation8 + $0x48] sm:$0xff]   ;;  %v1842_v1 = vld [vmem:[#allocation8 + $0x50] sm:$0xff]   ;;  %v2395_v10 = vshrl.u32 %v442_v9, 7  ;;  %p2007_p13 = pneg %p2006_p11  ;;  %s2008_s23 = sshll.u32 %s2090_s1, 4  ;;  %s2009_s23 = int_to_ptr.vmem [resolvable:$false] %s2008_s23 }
  0xb9   : > { %v1839_v62 = vld [vmem:[#allocation8] sm:$0xff]   ;;  %v1843_v2 = vld [vmem:[#allocation8 + $0x10] sm:$0xff]   ;;  %v1844_v3 = vld [vmem:[#allocation8 + $0x58] sm:$0xff]   ;;  %s2010_s27 = scalar_lea.vmem %s2009_s23, 1024  ;;  %p2011_p3 = scmp.lt.s32.totalorder %s2421_s25, %s2009_s23 }
  0xba   : > { %v1845_v4 = vld [vmem:[#allocation8 + $0x18] sm:$0xff]   ;;  %v1846_v5 = vld [vmem:[#allocation8 + $0x60] sm:$0xff]   ;;  %v1848_v7 = vld [vmem:[#allocation8 + $0x68] sm:$0xff]   ;;  %v444_v11 = vsub.s32 0, %v2395_v10  ;;  %v448_v13 = vsub.s32 1, %v2395_v10  ;;  %p2012_p7 = scmp.lt.s32.totalorder %s2010_s27, %s2004_s17 }
  0xbb   : > { %543 = vmatpush1.bf16.msra.mxu0 %v1783_v17  ;;  %842 = vmatpush1.bf16.msra.mxu1 %v1804_v28  ;;  %v1847_v6 = vld [vmem:[#allocation8 + $0x20] sm:$0xff]   ;;  %v1849_v8 = vld [vmem:[#allocation8 + $0x28] sm:$0xff]   ;;  %v1851_v9 = vld [vmem:[#allocation8 + $0x30] sm:$0xff]  }
  0xbc   : > { %544 = vmatprep.subr.bf16.mxu0 %v1784_v18  ;;  %843 = vmatprep.subr.bf16.mxu1 %v1805_v30  ;;  %v440_v12 = vld [vmem:[%s2471_s2] sm:$0x3]  ;;  %p2013_p9 = por %p2012_p7, %p2011_p3 }
  0xbd   : > { %v445_v14 = vrot.slane %v440_v12, %v444_v11  ;;  %v449_v15 = vrot.slane %v440_v12, %v448_v13  ;;  %v1852_v12 = vld [vmem:[#allocation8 + $0x78] sm:$0xff]  }
  0xbe   : > { %p2014_p12 = pnand %p2013_p9, %p2007_p13 }
  0xbf   : > { %545 = vmatpush1.bf16.msra.mxu0 %v1786_v21  ;;  %844 = vmatpush1.bf16.msra.mxu1 %v1807_v31 }
  0xc0   : > { %546 = vmatprep.subr.bf16.mxu0 %v1787_v22  ;;  %845 = vmatprep.subr.bf16.mxu1 %v1808_v32 }
  0xc3   : > { %547 = vmatpush1.bf16.msra.mxu0 %v1789_v24  ;;  %846 = vmatpush1.bf16.msra.mxu1 %v1810_v35 }
  0xc4   : > { %847 = vmatprep.subr.bf16.mxu1 %v1811_v36  ;;  %1580 = vmatprep.subr.bf16.mxu0 %v1838_v61 }
  0xc6   : > { %565 = vmatmul.mubr.bf16.vlgmr.msra.gmra.mrb[0].mxu0 %v420_v29 }
  0xc7   : > { %574 = vmatprep.mubr.bf16.mxu0 %v2089_v0  ;;  %848 = vmatpush1.bf16.msra.mxu1 %v1813_v38 }
  0xc8   : > { %849 = vmatprep.subr.bf16.mxu1 %v1814_v39  ;;  %1581 = vmatpush3.bf16.msra.mxu0 %v1839_v62 }
  0xc9   : > { %1582 = vmatprep.subr.bf16.mxu0 %v1840_v63 }
  0xcb   : > { %850 = vmatpush1.bf16.msra.mxu1 %v1816_v42 }
  0xcc   : > { %851 = vmatprep.subr.bf16.mxu1 %v1817_v43 }
  0xce   : > { %575 = vmatmul.mubr.bf16.gmra.mrb[4].mxu0 %v421_v37 }
  0xcf   : > { %584 = vmatprep.mubr.bf16.mxu0 %v2089_v0  ;;  %852 = vmatpush1.bf16.msra.mxu1 %v1819_v45 }
  0xd0   : > { %853 = vmatprep.subr.bf16.mxu1 %v1820_v46 }
  0xd3   : > { %854 = vmatpush1.bf16.msra.mxu1 %v1822_v49 }
  0xd4   : > { %855 = vmatprep.subr.bf16.mxu1 %v1823_v51 }
  0xd6   : > { %585 = vmatmul.mubr.bf16.gmra.mrb[8].mxu0 %v422_v44 }
  0xd7   : > { %594 = vmatprep.mubr.bf16.mxu0 %v2089_v0  ;;  %856 = vmatpush1.bf16.msra.mxu1 %v1825_v52  ;;  %v1841_v0 = vld [vmem:[#allocation8 + $0x8] sm:$0xff]  }
  0xd8   : > { %857 = vmatprep.subr.bf16.mxu1 %v1826_v53  ;;  %1583 = vmatpush3.bf16.msra.mxu0 %v1841_v0 }
  0xd9   : > { %1584 = vmatprep.subr.bf16.mxu0 %v1842_v1 }
  0xdb   : > { %858 = vmatpush1.bf16.msra.mxu1 %v1828_v54 }
  0xdc   : > { %859 = vmatprep.subr.bf16.mxu1 %v1829_v55  ;;  %1585 = vmatpush3.bf16.msra.mxu0 %v1843_v2 }
  0xdd   : > { %1586 = vmatprep.subr.bf16.mxu0 %v1844_v3 }
  0xde   : > { %595 = vmatmul.mubr.bf16.gmra.mrb[12].mxu0 %v423_v50 }
  0xdf   : > { %860 = vmatpush1.bf16.msra.mxu1 %v1831_v56 }
  0xe0   : > { %861 = vmatprep.subr.bf16.mxu1 %v1832_v57  ;;  %1587 = vmatpush3.bf16.msra.mxu0 %v1845_v4 }
  0xe1   : > { %1588 = vmatprep.subr.bf16.mxu0 %v1846_v5 }
  0xe3   : > { %862 = vmatpush1.bf16.msra.mxu1 %v1834_v58 }
  0xe4   : > { %863 = vmatprep.subr.bf16.mxu1 %v1835_v59  ;;  %1589 = vmatpush3.bf16.msra.mxu0 %v1847_v6 }
  0xe5   : > { %1590 = vmatprep.subr.bf16.mxu0 %v1848_v7 }
  0xe7   : > { %864 = vmatpush1.bf16.msra.mxu1 %v1837_v60 }
  0xe8   : > { %1591 = vmatpush3.bf16.msra.mxu0 %v1849_v8  ;;  %v1850_v8 = vld [vmem:[#allocation8 + $0x70] sm:$0xff]  }
  0xe9   : > { %1592 = vmatprep.subr.bf16.mxu0 %v1850_v8 }
  0xec   : > { %1593 = vmatpush3.bf16.msra.mxu0 %v1851_v9 }
  0xed   : > { %1594 = vmatprep.subr.bf16.mxu0 %v1852_v12  ;;  %v1857_v12 = vld [vmem:[#allocation10 + $0x18] sm:$0xff]  }
 0x199   : > { %v566_v16 = vpop.f32.mrb[0].mxu0 }
 0x19a   : > { %v567_v17 = vadd.f32 %v566_v16, %v445_v14  ;;  %v568_v18 = vpop.f32.mrb[1].mxu0  ;;  %v1853_v16 = vld [vmem:[#allocation8 + $0x38] sm:$0xff]  }
 0x19b   : > { %v569_v19 = vadd.f32 %v568_v18, %v449_v15  ;;  %v570_v20 = vpop.f32.mrb[2].mxu0  ;;  %1595 = vmatpush3.bf16.msra.mxu0 %v1853_v16  ;;  %v661_v18 = vld [vmem:[%s2473_s4] sm:$0x3] }
 0x19c   : > { %v571_v21 = vadd.f32 %v570_v20, %v445_v14  ;;  %v572_v22 = vpop.f32.mrb[3].mxu0  ;;  %v605_v24 = vmax.f32 %v567_v17, 0.0  ;;  %v1855_v17 = vld [vmem:[#allocation10 + $0x8] sm:$0xff]   ;;  %v670_v20 = vrot.slane %v661_v18, %v448_v13  ;;  %v1858_v16 = vld [vmem:[#allocation10 + $0x20] sm:$0xff]  }
 0x19d   : > { %v573_v23 = vadd.f32 %v572_v22, %v449_v15  ;;  %v606_v26 = vmax.f32 %v569_v19, 0.0  ;;  %v666_v19 = vrot.slane %v661_v18, %v444_v11 }
 0x19e   : > { %v607_v25 = vmax.f32 %v571_v21, 0.0 }
 0x19f   : > { %v608_v27 = vmax.f32 %v573_v23, 0.0 }
 0x1a0   : > { %v621_v28 = vpack.c.bf16 %v607_v25, %v605_v24 }
 0x1a1   : > { %v576_v29 = vpop.f32.mrb[4].mxu0  ;;  %v622_v30 = vpack.c.bf16 %v608_v27, %v606_v26 }
 0x1a2   : > { %v577_v31 = vadd.f32 %v576_v29, %v445_v14  ;;  %v578_v32 = vpop.f32.mrb[5].mxu0 }
 0x1a3   : > { %v579_v33 = vadd.f32 %v578_v32, %v449_v15  ;;  %v580_v34 = vpop.f32.mrb[6].mxu0  ;;  %865 = vmatprep.mubr.bf16.mxu1 %v622_v30 }
 0x1a4   : > { %v581_v35 = vadd.f32 %v580_v34, %v445_v14  ;;  %v582_v36 = vpop.f32.mrb[7].mxu0  ;;  %866 = vmatmul.mubr.bf16.vlgmr.msra.gmra.mrb[0].mxu1 %v621_v28  ;;  %v609_v38 = vmax.f32 %v577_v31, 0.0 }
 0x1a5   : > { %v583_v37 = vadd.f32 %v582_v36, %v449_v15  ;;  %v610_v40 = vmax.f32 %v579_v33, 0.0 }
 0x1a6   : > { %v611_v39 = vmax.f32 %v581_v35, 0.0 }
 0x1a7   : > { %v612_v41 = vmax.f32 %v583_v37, 0.0 }
 0x1a8   : > { %v623_v42 = vpack.c.bf16 %v611_v39, %v609_v38 }
 0x1a9   : > { %v624_v43 = vpack.c.bf16 %v612_v41, %v610_v40  ;;  %v586_v44 = vpop.f32.mrb[8].mxu0 }
 0x1aa   : > { %v587_v45 = vadd.f32 %v586_v44, %v445_v14  ;;  %v588_v46 = vpop.f32.mrb[9].mxu0 }
 0x1ab   : > { %v589_v47 = vadd.f32 %v588_v46, %v449_v15  ;;  %v590_v48 = vpop.f32.mrb[10].mxu0  ;;  %875 = vmatprep.mubr.bf16.mxu1 %v624_v43 }
 0x1ac   : > { %v591_v49 = vadd.f32 %v590_v48, %v445_v14  ;;  %v592_v50 = vpop.f32.mrb[11].mxu0  ;;  %876 = vmatmul.mubr.bf16.gmra.mrb[4].mxu1 %v623_v42  ;;  %v613_v52 = vmax.f32 %v587_v45, 0.0 }
 0x1ad   : > { %v593_v51 = vadd.f32 %v592_v50, %v449_v15  ;;  %v614_v54 = vmax.f32 %v589_v47, 0.0 }
 0x1ae   : > { %v615_v53 = vmax.f32 %v591_v49, 0.0 }
 0x1af   : > { %v616_v55 = vmax.f32 %v593_v51, 0.0 }
 0x1b0   : > { %v625_v56 = vpack.c.bf16 %v615_v53, %v613_v52 }
 0x1b1   : > { %v626_v57 = vpack.c.bf16 %v616_v55, %v614_v54  ;;  %v596_v58 = vpop.f32.mrb[12].mxu0 }
 0x1b2   : > { %v597_v59 = vadd.f32 %v596_v58, %v445_v14  ;;  %v598_v60 = vpop.f32.mrb[13].mxu0 }
 0x1b3   : > { %v599_v61 = vadd.f32 %v598_v60, %v449_v15  ;;  %v600_v62 = vpop.f32.mrb[14].mxu0  ;;  %885 = vmatprep.mubr.bf16.mxu1 %v626_v57 }
 0x1b4   : > { %v601_v63 = vadd.f32 %v600_v62, %v445_v14  ;;  %v602_v0 = vpop.f32.mrb[15].mxu0  ;;  %886 = vmatmul.mubr.bf16.gmra.mrb[8].mxu1 %v625_v56  ;;  %v617_v2 = vmax.f32 %v597_v59, 0.0  ;;  %v1854_v14 = vld [vmem:[#allocation10] sm:$0xff]  }
 0x1b5   : > { %v603_v1 = vadd.f32 %v602_v0, %v449_v15  ;;  %v618_v4 = vmax.f32 %v599_v61, 0.0  ;;  %1632 = vmatprep.subr.bf16.mxu0 %v1854_v14  ;;  %1656 = vmatprep.subr.bf16.mxu1 %v1854_v14  ;;  %v1856_v15 = vld [vmem:[#allocation10 + $0x10] sm:$0xff]  }
 0x1b6   : > { %v619_v3 = vmax.f32 %v601_v63, 0.0  ;;  %1664 = vmatpush3.bf16.msra.mxu1 %v1854_v14 }
 0x1b7   : > { %v620_v5 = vmax.f32 %v603_v1, 0.0  ;;  %1657 = vmatprep.subr.bf16.mxu1 %v1855_v17 }
 0x1b8   : > { %v627_v6 = vpack.c.bf16 %v619_v3, %v617_v2 }
 0x1b9   : > { %v628_v7 = vpack.c.bf16 %v620_v5, %v618_v4 }
 0x1ba   : > { %1665 = vmatpush3.bf16.msra.mxu1 %v1855_v17 }
 0x1bb   : > { %895 = vmatprep.mubr.bf16.mxu1 %v628_v7  ;;  %1658 = vmatprep.subr.bf16.mxu1 %v1856_v15 }
 0x1bc   : > { %896 = vmatmul.mubr.bf16.gmra.mrb[12].mxu1 %v627_v6 }
 0x1be   : > { %1666 = vmatpush3.bf16.msra.mxu1 %v1856_v15 }
 0x1bf   : > { %1659 = vmatprep.subr.bf16.mxu1 %v1857_v12 }
 0x1c2   : > { %1667 = vmatpush3.bf16.msra.mxu1 %v1857_v12 }
 0x1c3   : > { %1660 = vmatprep.subr.bf16.mxu1 %v1858_v16 }
 0x1c6   : > { %1668 = vmatpush3.bf16.msra.mxu1 %v1858_v16 }
 0x277   : > { %v867_v21 = vpop.f32.mrb[0].mxu1 }
 0x278   : > { %v868_v22 = vadd.f32 %v867_v21, %v666_v19  ;;  %v869_v23 = vpop.f32.mrb[1].mxu1 }
 0x279   : > { %v870_v24 = vadd.f32 %v869_v23, %v670_v20  ;;  %v871_v25 = vpop.f32.mrb[2].mxu1 }
 0x27a   : > { %v872_v26 = vadd.f32 %v871_v25, %v666_v19  ;;  %v873_v27 = vpop.f32.mrb[3].mxu1  ;;  %v906_v29 = vmax.f32 %v868_v22, 0.0 }
 0x27b   : > { %v874_v28 = vadd.f32 %v873_v27, %v670_v20  ;;  %v907_v31 = vmax.f32 %v870_v24, 0.0 }
 0x27c   : > { %v908_v30 = vmax.f32 %v872_v26, 0.0 }
 0x27d   : > { %v909_v32 = vmax.f32 %v874_v28, 0.0 }
 0x27e   : > { %v922_v33 = vpack.c.bf16 %v908_v30, %v906_v29 }
 0x27f   : > { %v923_v34 = vpack.c.bf16 %v909_v32, %v907_v31  ;;  %v877_v35 = vpop.f32.mrb[4].mxu1 }
 0x280   : > { %v878_v36 = vadd.f32 %v877_v35, %v666_v19  ;;  %v879_v11 = vpop.f32.mrb[5].mxu1 }
 0x281   : > { %v880_v37 = vadd.f32 %v879_v11, %v670_v20  ;;  %v881_v10 = vpop.f32.mrb[6].mxu1  ;;  %1097 = vmatprep.mubr.bf16.mxu0 %v923_v34 }
 0x282   : > { %v882_v13 = vadd.f32 %v881_v10, %v666_v19  ;;  %v883_v38 = vpop.f32.mrb[7].mxu1  ;;  %1098 = vmatmul.mubr.bf16.vlgmr.msra.gmra.mrb[16].mxu0 %v922_v33  ;;  %v910_v40 = vmax.f32 %v878_v36, 0.0 }
 0x283   : > { %v884_v39 = vadd.f32 %v883_v38, %v670_v20  ;;  %1633 = vmatpush3.bf16.msra.mxu0 %v1854_v14  ;;  %v911_v42 = vmax.f32 %v880_v37, 0.0  ;;  %v1859_v14 = vld [vmem:[#allocation10 + $0x28] sm:$0xff]  }
 0x284   : > { %v912_v41 = vmax.f32 %v882_v13, 0.0  ;;  %1634 = vmatprep.subr.bf16.mxu0 %v1855_v17  ;;  %1661 = vmatprep.subr.bf16.mxu1 %v1859_v14 }
 0x285   : > { %v913_v43 = vmax.f32 %v884_v39, 0.0  ;;  %1669 = vmatpush3.bf16.msra.mxu1 %v1859_v14 }
 0x286   : > { %v924_v44 = vpack.c.bf16 %v912_v41, %v910_v40 }
 0x287   : > { %v925_v45 = vpack.c.bf16 %v913_v43, %v911_v42  ;;  %v887_v46 = vpop.f32.mrb[8].mxu1  ;;  %1635 = vmatpush3.bf16.msra.mxu0 %v1855_v17  ;;  %v1860_v17 = vld [vmem:[#allocation10 + $0x30] sm:$0xff]  }
 0x288   : > { %v888_v47 = vadd.f32 %v887_v46, %v666_v19  ;;  %v889_v48 = vpop.f32.mrb[9].mxu1  ;;  %1636 = vmatprep.subr.bf16.mxu0 %v1856_v15  ;;  %1662 = vmatprep.subr.bf16.mxu1 %v1860_v17 }
 0x289   : > { %v890_v49 = vadd.f32 %v889_v48, %v670_v20  ;;  %v891_v50 = vpop.f32.mrb[10].mxu1  ;;  %1105 = vmatprep.mubr.bf16.mxu0 %v925_v45  ;;  %1670 = vmatpush3.bf16.msra.mxu1 %v1860_v17 }
 0x28a   : > { %v892_v51 = vadd.f32 %v891_v50, %v666_v19  ;;  %v893_v52 = vpop.f32.mrb[11].mxu1  ;;  %1106 = vmatmul.mubr.bf16.gmra.mrb[20].mxu0 %v924_v44  ;;  %v914_v54 = vmax.f32 %v888_v47, 0.0 }
 0x28b   : > { %v894_v53 = vadd.f32 %v893_v52, %v670_v20  ;;  %1637 = vmatpush3.bf16.msra.mxu0 %v1856_v15  ;;  %v915_v56 = vmax.f32 %v890_v49, 0.0  ;;  %v1861_v15 = vld [vmem:[#allocation10 + $0x38] sm:$0xff]  }
 0x28c   : > { %v916_v55 = vmax.f32 %v892_v51, 0.0  ;;  %1638 = vmatprep.subr.bf16.mxu0 %v1857_v12  ;;  %1663 = vmatprep.subr.bf16.mxu1 %v1861_v15 }
 0x28d   : > { %v917_v57 = vmax.f32 %v894_v53, 0.0  ;;  %1671 = vmatpush3.bf16.msra.mxu1 %v1861_v15 }
 0x28e   : > { %v926_v58 = vpack.c.bf16 %v916_v55, %v914_v54 }
 0x28f   : > { %v927_v59 = vpack.c.bf16 %v917_v57, %v915_v56  ;;  %v897_v60 = vpop.f32.mrb[12].mxu1  ;;  %1639 = vmatpush3.bf16.msra.mxu0 %v1857_v12 }
 0x290   : > { %v898_v61 = vadd.f32 %v897_v60, %v666_v19  ;;  %v899_v62 = vpop.f32.mrb[13].mxu1  ;;  %1640 = vmatprep.subr.bf16.mxu0 %v1858_v16 }
 0x291   : > { %v900_v63 = vadd.f32 %v899_v62, %v670_v20  ;;  %v901_v0 = vpop.f32.mrb[14].mxu1  ;;  %1113 = vmatprep.mubr.bf16.mxu0 %v927_v59 }
 0x292   : > { %v902_v1 = vadd.f32 %v901_v0, %v666_v19  ;;  %v903_v2 = vpop.f32.mrb[15].mxu1  ;;  %1114 = vmatmul.mubr.bf16.gmra.mrb[24].mxu0 %v926_v58  ;;  %v918_v4 = vmax.f32 %v898_v61, 0.0  ;;  %v1508_v19 = vld [vmem:[%s2475_s6] ss:$0 sm:$0xff] }
 0x293   : > { %v904_v3 = vadd.f32 %v903_v2, %v670_v20  ;;  %v919_v6 = vmax.f32 %v900_v63, 0.0  ;;  %1641 = vmatpush3.bf16.msra.mxu0 %v1858_v16  ;;  %v1525_v61 = vld [vmem:[%s2477_s8] ss:$0 sm:$0xff] }
 0x294   : > { %v920_v5 = vmax.f32 %v902_v1, 0.0  ;;  %1642 = vmatprep.subr.bf16.mxu0 %v1859_v14 }
 0x295   : > { %v921_v7 = vmax.f32 %v904_v3, 0.0 }
 0x296   : > { %v928_v8 = vpack.c.bf16 %v920_v5, %v918_v4 }
 0x297   : > { %v929_v9 = vpack.c.bf16 %v921_v7, %v919_v6  ;;  %1643 = vmatpush3.bf16.msra.mxu0 %v1859_v14 }
 0x298   : > { %1644 = vmatprep.subr.bf16.mxu0 %v1860_v17 }
 0x299   : > { %1121 = vmatprep.mubr.bf16.mxu0 %v929_v9 }
 0x29a   : > { %1122 = vmatmul.mubr.bf16.gmra.mrb[28].mxu0 %v928_v8 }
 0x29b   : > { %1645 = vmatpush3.bf16.msra.mxu0 %v1860_v17 }
 0x29c   : > { %1646 = vmatprep.subr.bf16.mxu0 %v1861_v15 }
 0x29f   : > { %1647 = vmatpush3.bf16.msra.mxu0 %v1861_v15 }
 0x355   : > { %v1596_v18 = vpop.f32.mrb[16].mxu0 }
 0x356   : > { %v1597_v20 = vpop.f32.mrb[17].mxu0 }
 0x357   : > { %v1598_v21 = vadd.f32 %v1597_v20, %v1596_v18  ;;  %v1599_v22 = vpop.f32.mrb[18].mxu0 }
 0x358   : > { %v1600_v23 = vpop.f32.mrb[19].mxu0 }
 0x359   : > { %v1100_v24 = vadd.f32 %v1598_v21, %v1508_v19  ;;  %v1601_v25 = vadd.f32 %v1600_v23, %v1599_v22 }
 0x35b   : > { %v1103_v26 = vadd.f32 %v1601_v25, %v1508_v19  ;;  %v1130_v27 = vmax.f32 %v1100_v24, 0.0 }
 0x35d   : > { %v1131_v28 = vmax.f32 %v1103_v26, 0.0  ;;  %v1602_v29 = vpop.f32.mrb[20].mxu0 }
 0x35e   : > { %v1603_v30 = vpop.f32.mrb[21].mxu0 }
 0x35f   : > { %v1604_v31 = vadd.f32 %v1603_v30, %v1602_v29  ;;  %v1605_v32 = vpop.f32.mrb[22].mxu0  ;;  %v1138_v33 = vpack.c.bf16 %v1131_v28, %v1130_v27 }
 0x360   : > { %v1606_v34 = vpop.f32.mrb[23].mxu0 }
 0x361   : > { %v1108_v35 = vadd.f32 %v1604_v31, %v1508_v19  ;;  %v1607_v36 = vadd.f32 %v1606_v34, %v1605_v32  ;;  %1648 = vmatprep.mubr.bf16.mxu0 %v1138_v33 }
 0x363   : > { %v1111_v11 = vadd.f32 %v1607_v36, %v1508_v19  ;;  %v1132_v37 = vmax.f32 %v1108_v35, 0.0 }
 0x365   : > { %v1133_v10 = vmax.f32 %v1111_v11, 0.0  ;;  %v1608_v13 = vpop.f32.mrb[24].mxu0 }
 0x366   : > { %v1609_v38 = vpop.f32.mrb[25].mxu0 }
 0x367   : > { %v1139_v39 = vpack.c.bf16 %v1133_v10, %v1132_v37  ;;  %v1610_v40 = vadd.f32 %v1609_v38, %v1608_v13  ;;  %v1611_v41 = vpop.f32.mrb[26].mxu0 }
 0x368   : > { %v1612_v42 = vpop.f32.mrb[27].mxu0 }
 0x369   : > { %v1116_v43 = vadd.f32 %v1610_v40, %v1508_v19  ;;  %v1613_v44 = vadd.f32 %v1612_v42, %v1611_v41  ;;  %1649 = vmatmul.mubr.bf16.vlgmr.msra.gmra.mrb[32].mxu0 %v1139_v39 }
 0x36b   : > { %v1119_v45 = vadd.f32 %v1613_v44, %v1508_v19  ;;  %v1134_v46 = vmax.f32 %v1116_v43, 0.0 }
 0x36d   : > { %v1135_v47 = vmax.f32 %v1119_v45, 0.0  ;;  %v1614_v48 = vpop.f32.mrb[28].mxu0 }
 0x36e   : > { %v1615_v49 = vpop.f32.mrb[29].mxu0 }
 0x36f   : > { %v1616_v50 = vadd.f32 %v1615_v49, %v1614_v48  ;;  %v1617_v51 = vpop.f32.mrb[30].mxu0  ;;  %v1140_v52 = vpack.c.bf16 %v1135_v47, %v1134_v46 }
 0x370   : > { %v1618_v53 = vpop.f32.mrb[31].mxu0 }
 0x371   : > { %v1124_v54 = vadd.f32 %v1616_v50, %v1508_v19  ;;  %v1619_v55 = vadd.f32 %v1618_v53, %v1617_v51  ;;  %1652 = vmatprep.mubr.bf16.mxu1 %v1140_v52 }
 0x373   : > { %v1127_v56 = vadd.f32 %v1619_v55, %v1508_v19  ;;  %v1136_v57 = vmax.f32 %v1124_v54, 0.0 }
 0x375   : > { %v1137_v58 = vmax.f32 %v1127_v56, 0.0 }
 0x377   : > { %v1141_v59 = vpack.c.bf16 %v1137_v58, %v1136_v57 }
 0x379   : > { %1653 = vmatmul.mubr.bf16.vlgmr.msra.gmra.mrb[16].mxu1 %v1141_v59 }
 0x43c   : > { %v1650_v60 = vpop.f32.mrb[32].mxu0 }
 0x43d   : > { %v1247_v62 = vpop.f32.mrb[33].mxu0  ;;  %v1256_v0 = vadd.f32 %v1650_v60, %v1525_v61 }
 0x43e   : > { %v1651_v63 = vpop.f32.mrb[34].mxu0  ;;  %v1248_v3 = vadd.f32 %v1525_v61, %v1247_v62 }
 0x43f   : > { %v1259_v1 = vadd.f32 %v1651_v63, %v1525_v61  ;;  %v1250_v2 = vpop.f32.mrb[35].mxu0 }
 0x440   : > { %v1251_v4 = vadd.f32 %v1525_v61, %v1250_v2 }
 0x441   : > { %v1565_v5 = vpack.c.bf16 %v1259_v1, %v1256_v0 }
 0x442   : > { %v1560_v6 = vpack.c.bf16 %v1251_v4, %v1248_v3 }
 0x443   : > { %1577 = vst [vmem:[%s408_s30 + $0x8] sm:$0xff] %v1565_v5  }
 0x444   : > { %1561 = vst [vmem:[%s408_s30] sm:$0xff] %v1560_v6  }
 0x44c   : > { %v1654_v7 = vpop.f32.mrb[16].mxu1 }
 0x44d   : > { %v1263_v8 = vpop.f32.mrb[17].mxu1  ;;  %v1272_v12 = vadd.f32 %v1654_v7, %v1525_v61 }
 0x44e   : > { %v1655_v9 = vpop.f32.mrb[18].mxu1  ;;  %v1264_v17 = vadd.f32 %v1525_v61, %v1263_v8 }
 0x44f   : > { %v1275_v16 = vadd.f32 %v1655_v9, %v1525_v61  ;;  %v1266_v14 = vpop.f32.mrb[19].mxu1 }
 0x450   : > { %v1267_v15 = vadd.f32 %v1525_v61, %v1266_v14 }
 0x451   : > { %v1575_v18 = vpack.c.bf16 %v1275_v16, %v1272_v12 }
 0x452   : > { %v1570_v19 = vpack.c.bf16 %v1267_v15, %v1264_v17 }
 0x453   : > { %1579 = vst [vmem:[%s408_s30 + $0x18] sm:$0xff] %v1575_v18  }
 0x454   : > { %1578 = vst [vmem:[%s408_s30 + $0x10] sm:$0xff] %v1570_v19  }
 0x455   : > { %2017 = shalt.err (!%p2014_p12)
}
 0x456   : > { %s2018_s26 = scalar_lea.hbm %s2426_s15, 512  ;;  %s2022_s22 = scalar_lea.hbm %s2478_s9, 2048 }
 0x457   : > { %p2019_p0 = scmp.ne.s32.totalorder %s2426_s15, %s2018_s26  ;;  %p2023_p1 = scmp.lt.u32.totalorder %s2426_s15, %s2478_s9 }
 0x458   : > { %p2024_p2 = scmp.lt.u32.totalorder %s2022_s22, %s2018_s26  ;;  %p2026_p6 = scmp.lt.u32.totalorder %s2018_s26, %s2426_s15 }
 0x459   : > { %p2020_p5 = pnand %p2019_p0, %p2313_p8 }
 0x45a   : > { %p2025_p4 = por %p2024_p2, %p2023_p1 }
 0x45b   : > { %p2021_p10 = pneg %p2020_p5 }
 0x45c   : > { %p2027_p11 = por %p2026_p6, %p2025_p4 }
 0x45e   : > { %p2028_p13 = pnand %p2027_p11, %p2021_p10 }
 0x460   : > { %2031 = shalt.err (!%p2028_p13)
}
 0x461   : > { %s2091_s24 = smov 64   ;;  %s2092_s16 = smov 4  }
 0x462   : > { %1690 = dma.vmem_to_hbm [thread:$0]  (%p2313_p8), %s2421_s25, 512, %s2426_s15, %s1319_s13, %s2091_s24, %s2091_s24, %s2092_s16  }
 0x463 PF: > { %s2510_s17 = sld [smem:[#allocation16_spill]]  ;;  %s2511_s1 = sld [smem:[#allocation17_spill]] }
 0x464   : > { %p1722_p3 = scmp.ge.s32.totalorder %s2078_s12, 2 }
 0x469   : > { %s1347_s23 = sand.u32 1, %s2510_s17   ;;  %p2512_p7 = scmp.ne.s32.totalorder %s2511_s1, 0 }
 0x46a   : > { %s1348_s27 = scalar_lea.sflag [#allocation4], %s1347_s23 }
 0x46b   : > { %p1710_p9 = pnand %p1722_p3, %p2512_p7 }
 0x46d   : > { %2061 = dma.done.wait (!%p1710_p9), %s1348_s27, 512  }
 0x46e   : > { %2063 = vsyncadd (!%p1710_p9), %s1348_s27, 4294966784  ;;  %p24_p12 = scmp.ge.s32.totalorder %s2300_s20, 6   ;;  %s2513_s30 = smov %s2070_s10 }
 0x46f   : > { %s2514_s10 = smov %s2074_s11  ;;  %s2515_s11 = smov %s2309_s18 }
 0x470   : > { %s2516_s12 = smov %s2300_s20  ;;  %26 = sbr.rel (!%p24_p12) target bundleno = 9 (0x9), region = 117 }
 0x477   :  { %1353 = vsyncpa [#allocation3], 1 }
 0x478   :  { %1355 = vsyncpa [#allocation3 + $0x1], 1 }
 0x479   :  { %1356 = vsyncpa [#allocation6], 1 }
 0x47a   :  { %1357 = vsyncpa [#allocation9], 1 }
 0x47b   :  { %1358 = vsyncpa [#allocation4], 1 }
 0x47c   :  { %1360 = vsyncpa [#allocation4 + $0x1], 1 }

</bundles_post_ra>
